<compile_context>
chip_gen: v5e
topology: v5e:2x2
jax: 0.10.0
libtpu: 0.0.40
codegen_flags: <defaults>
</compile_context>

<pallas_src>
import jax
import jax.numpy as jnp
from jax import lax
from jax.experimental import pallas as pl
from jax.experimental.pallas import tpu as pltpu


def _rnn_classify_kernel(xp_ref, whh_ref, wcls_ref, bcls_ref, out_ref):
    """xp_ref:   (S, Bb, D)  pre-projected inputs x_t @ W_ih^T + (b_ih+b_hh), time-major
       whh_ref:  (D, D)      W_hh^T
       wcls_ref: (D, Cp)     classifier weight^T, zero-padded to Cp (>=128) lanes
       bcls_ref: (1, Cp)     classifier bias, padded lanes = -1e30
       out_ref:  (Bb, Cp)    softmax probabilities (padded lanes ~0)
    """
    S, Bb, D = xp_ref.shape

    whh = whh_ref[...]
    h0 = jnp.zeros((Bb, D), dtype=jnp.float32)

    # Serial recurrence: one MXU matmul + one EUP tanh per step.  Partially
    # unrolled (fully at S<=8) so the scheduler can overlap the MXU push of
    # step t+1 with the tanh of step t without exploding live ranges.
    def step(t, h):
        pre = xp_ref[t] + jnp.dot(
            h.astype(whh.dtype), whh, preferred_element_type=jnp.float32
        )
        return jnp.tanh(pre)

    h_n = lax.fori_loop(0, S, step, h0, unroll=min(int(S), 8))  # == h_n.squeeze(0)

    # Classifier + softmax over dim=1.  Output is lane-dense (Cp >= 128 lanes);
    # padded logits are -1e30 so they exp() to exactly 0.
    logits = (
        jnp.dot(h_n.astype(wcls_ref.dtype), wcls_ref[...],
                preferred_element_type=jnp.float32)
        + bcls_ref[...]
    )                                                     # (Bb, Cp) f32
    m = jnp.max(logits, axis=-1, keepdims=True)
    e = jnp.exp(logits - m)
    denom = jnp.sum(e, axis=-1, keepdims=True)
    # EUP approximate reciprocal: same per-row factor, so argmax/ordering exact.
    out_ref[...] = e * pl.reciprocal(denom, approx=True)


def rnn_model_forward(x_ids, params, *, block_b=128, matmul_dtype=jnp.float32):
    """Inference path of RNNModel.forward (y=None): returns softmax probs (B, C).

    matmul_dtype: set to jnp.bfloat16 on v6e/v7x to run the GEMMs in bf16 with
    f32 accumulation (h / tanh / softmax stay f32).
    """
    emb = params["embedding"]            # (vocab, D), row 0 zeroed (padding_idx=0)
    w_ih = params["w_ih"]                # (D, D)  PyTorch: h = tanh(x @ W_ih^T + ...)
    w_hh = params["w_hh"]                # (D, D)
    b_ih = params["b_ih"]                # (D,)
    b_hh = params["b_hh"]                # (D,)
    w_cls = params["w_cls"]              # (C, D)
    b_cls = params["b_cls"]              # (C,)

    B, S = x_ids.shape
    D = emb.shape[1]
    C = w_cls.shape[0]

    # --- Fold the input projection + fused bias into the embedding table.
    # Embedding lookup is a row-select, so gather(emb)[t] @ W_ih^T + b ==
    # gather(emb @ W_ih^T + b)[t]: this deletes the in-kernel GEMM and xproj copy.
    proj_table = (emb.astype(jnp.float32) @ w_ih.T.astype(jnp.float32)
                  + (b_ih + b_hh).astype(jnp.float32))     # (vocab, D) f32

    # --- Batch blocking: multiples of 8 sublanes; keep >= 2 blocks when the
    # padded batch allows it (v7x megacore sharding via "parallel").
    Bp_min = max(8, ((B + 7) // 8) * 8)
    block_b = max(8, (int(block_b) // 8) * 8)
    block_b = min(block_b, Bp_min)
    if Bp_min >= 16 and Bp_min // block_b < 2:
        block_b = max(8, ((Bp_min // 2) // 8) * 8)
    Bp = ((Bp_min + block_b - 1) // block_b) * block_b

    # Padded rows use token id 0 (padding row); they are sliced off afterwards.
    x_ids_p = jnp.pad(x_ids, ((0, Bp - B), (0, 0)))

    # Time-major gather of the *projected* table: (S, Bp, D), no transpose pass.
    # TODO(synk): at realistic S*B*D, gather rows directly into VMEM via
    # scalar-prefetched ids (PrefetchScalarGridSpec + pl.Element) so the
    # projected sequence never materializes in HBM.
    xp = jnp.take(proj_table, x_ids_p.T, axis=0).astype(jnp.float32)  # (S, Bp, D)

    whh_t = w_hh.T.astype(matmul_dtype)                    # (D, D)

    # Lane-dense classifier: pad output lanes to a multiple of 128.
    Cp = max(128, ((C + 127) // 128) * 128)
    wcls_t = jnp.zeros((D, Cp), matmul_dtype).at[:, :C].set(
        w_cls.T.astype(matmul_dtype))                      # (D, Cp)
    bcls = jnp.full((1, Cp), -1e30, jnp.float32).at[0, :C].set(
        b_cls.astype(jnp.float32))                         # (1, Cp)

    out = pl.pallas_call(
        _rnn_classify_kernel,
        out_shape=jax.ShapeDtypeStruct((Bp, Cp), jnp.float32),
        grid_spec=pltpu.PrefetchScalarGridSpec(
            num_scalar_prefetch=0,
            grid=(Bp // block_b,),                         # batch-parallel grid axis
            in_specs=[
                pl.BlockSpec((S, block_b, D), lambda i: (0, i, 0)),  # projected inputs
                pl.BlockSpec((D, D), lambda i: (0, 0)),              # W_hh^T
                pl.BlockSpec((D, Cp), lambda i: (0, 0)),             # W_cls^T (padded)
                pl.BlockSpec((1, Cp), lambda i: (0, 0)),             # b_cls (padded)
            ],
            out_specs=pl.BlockSpec((block_b, Cp), lambda i: (i, 0)),
        ),
        compiler_params=pltpu.CompilerParams(
            dimension_semantics=("parallel",),             # shard batch blocks across TCs
        ),
    )(xp, whh_t, wcls_t, bcls)
    return out[:B, :C]


def init_params(key, vocab_size, vector_dim, num_classes):
    ks = jax.random.split(key, 7)
    emb = 0.1 * jax.random.normal(ks[0], (vocab_size, vector_dim), jnp.float32)
    emb = emb.at[0].set(0.0)  # padding_idx=0
    w_ih = 0.1 * jax.random.normal(ks[1], (vector_dim, vector_dim), jnp.float32)
    w_hh = 0.1 * jax.random.normal(ks[2], (vector_dim, vector_dim), jnp.float32)
    b_ih = 0.1 * jax.random.normal(ks[3], (vector_dim,), jnp.float32)
    b_hh = 0.1 * jax.random.normal(ks[4], (vector_dim,), jnp.float32)
    w_cls = 0.1 * jax.random.normal(ks[5], (num_classes, vector_dim), jnp.float32)
    b_cls = 0.1 * jax.random.normal(ks[6], (num_classes,), jnp.float32)
    return dict(embedding=emb, w_ih=w_ih, w_hh=w_hh, b_ih=b_ih, b_hh=b_hh,
                w_cls=w_cls, b_cls=b_cls)


def reference_forward(x_ids, params):
    """Pure-JAX reference matching nn.Embedding + nn.RNN + nn.Linear + softmax."""
    emb = jnp.take(params["embedding"], x_ids, axis=0)  # (B, S, D)
    B, S, D = emb.shape
    h = jnp.zeros((B, D), jnp.float32)
    for t in range(S):
        h = jnp.tanh(emb[:, t, :] @ params["w_ih"].T + params["b_ih"]
                     + h @ params["w_hh"].T + params["b_hh"])
    logits = h @ params["w_cls"].T + params["b_cls"]
    return jax.nn.softmax(logits, axis=1)


if __name__ == "__main__":
    vector_dim = 32
    sentence_length = 8
    vocab_size = 30
    num_classes = 4
    batch = 2

    key = jax.random.PRNGKey(0)
    k_param, k_data = jax.random.split(key)
    params = init_params(k_param, vocab_size, vector_dim, num_classes)

    x_ids = jax.random.randint(k_data, (batch, sentence_length), 0, vocab_size,
                               dtype=jnp.int32)

    probs = rnn_model_forward(x_ids, params)
    probs = jax.block_until_ready(probs)

    ref = reference_forward(x_ids, params)
    assert probs.shape == (batch, num_classes)
    # Tolerance loosened slightly only because the softmax denominator uses the
    # EUP approximate reciprocal (set approx=False in the kernel for exact).
    assert jnp.allclose(probs, ref, atol=5e-3, rtol=5e-3)
    assert jnp.allclose(jnp.sum(probs, axis=-1), 1.0, atol=5e-3)
    assert jnp.array_equal(jnp.argmax(probs, axis=-1), jnp.argmax(ref, axis=-1))
    # TODO(synk): training path (CrossEntropyLoss when y is provided) not implemented;
    # only the inference (softmax) branch of forward() is reproduced.
    print("KERNEL_OK")
</pallas_src>

<mosaic_0001>
module attributes {stable_mosaic.version = 11 : i64} {
  func.func @_rnn_classify_kernel(%arg0: i32, %arg1: memref<8x8x32xf32, #tpu.memory_space<vmem>>, %arg2: memref<32x32xf32, #tpu.memory_space<vmem>>, %arg3: memref<32x128xf32, #tpu.memory_space<vmem>>, %arg4: memref<1x128xf32, #tpu.memory_space<vmem>>, %arg5: memref<8x128xf32, #tpu.memory_space<vmem>>) attributes {dimension_semantics = [#tpu.dimension_semantics<parallel>], iteration_bounds = array<i64: 1>, scalar_prefetch = 0 : i64, scratch_operands = 0 : i64, tpu.core_type = #tpu.core_type<tc>, window_params = [{transform_indices = @transform_0, window_bounds = array<i64: 8, 8, 32>}, {pipeline_mode = #tpu.pipeline_mode<synchronous>, transform_indices = @transform_1, window_bounds = array<i64: 32, 32>}, {pipeline_mode = #tpu.pipeline_mode<synchronous>, transform_indices = @transform_2, window_bounds = array<i64: 32, 128>}, {pipeline_mode = #tpu.pipeline_mode<synchronous>, transform_indices = @transform_3, window_bounds = array<i64: 1, 128>}, {transform_indices = @transform_4, window_bounds = array<i64: 8, 128>}]} {
    %c0 = arith.constant 0 : index
    %c0_0 = arith.constant 0 : index
    %0 = vector.load %arg2[%c0, %c0_0] : memref<32x32xf32, #tpu.memory_space<vmem>>, vector<32x32xf32>
    %cst = arith.constant 0.000000e+00 : f32
    %1 = vector.broadcast %cst : f32 to vector<8x32xf32>
    %c0_i32 = arith.constant 0 : i32
    %2 = arith.index_cast %c0_i32 : i32 to index
    %c0_1 = arith.constant 0 : index
    %c0_2 = arith.constant 0 : index
    %3 = vector.load %arg1[%2, %c0_1, %c0_2] : memref<8x8x32xf32, #tpu.memory_space<vmem>>, vector<1x8x32xf32>
    %4 = vector.shape_cast %3 : vector<1x8x32xf32> to vector<8x32xf32>
    %cst_3 = arith.constant dense<0.000000e+00> : vector<8x32xf32>
    %5 = tpu.matmul %1, %0, %cst_3 {dimension_numbers = #tpu.dot_dimension_numbers<[1], [0], [0], [1], [0, 0, 1, 1], [], []>} : vector<8x32xf32>, vector<32x32xf32>, vector<8x32xf32> -> vector<8x32xf32>
    %6 = arith.addf %4, %5 : vector<8x32xf32>
    %7 = math.tanh %6 : vector<8x32xf32>
    %c1_i32 = arith.constant 1 : i32
    %8 = arith.index_cast %c1_i32 : i32 to index
    %c0_4 = arith.constant 0 : index
    %c0_5 = arith.constant 0 : index
    %9 = vector.load %arg1[%8, %c0_4, %c0_5] : memref<8x8x32xf32, #tpu.memory_space<vmem>>, vector<1x8x32xf32>
    %10 = vector.shape_cast %9 : vector<1x8x32xf32> to vector<8x32xf32>
    %cst_6 = arith.constant dense<0.000000e+00> : vector<8x32xf32>
    %11 = tpu.matmul %7, %0, %cst_6 {dimension_numbers = #tpu.dot_dimension_numbers<[1], [0], [0], [1], [0, 0, 1, 1], [], []>} : vector<8x32xf32>, vector<32x32xf32>, vector<8x32xf32> -> vector<8x32xf32>
    %12 = arith.addf %10, %11 : vector<8x32xf32>
    %13 = math.tanh %12 : vector<8x32xf32>
    %c2_i32 = arith.constant 2 : i32
    %14 = arith.index_cast %c2_i32 : i32 to index
    %c0_7 = arith.constant 0 : index
    %c0_8 = arith.constant 0 : index
    %15 = vector.load %arg1[%14, %c0_7, %c0_8] : memref<8x8x32xf32, #tpu.memory_space<vmem>>, vector<1x8x32xf32>
    %16 = vector.shape_cast %15 : vector<1x8x32xf32> to vector<8x32xf32>
    %cst_9 = arith.constant dense<0.000000e+00> : vector<8x32xf32>
    %17 = tpu.matmul %13, %0, %cst_9 {dimension_numbers = #tpu.dot_dimension_numbers<[1], [0], [0], [1], [0, 0, 1, 1], [], []>} : vector<8x32xf32>, vector<32x32xf32>, vector<8x32xf32> -> vector<8x32xf32>
    %18 = arith.addf %16, %17 : vector<8x32xf32>
    %19 = math.tanh %18 : vector<8x32xf32>
    %c3_i32 = arith.constant 3 : i32
    %20 = arith.index_cast %c3_i32 : i32 to index
    %c0_10 = arith.constant 0 : index
    %c0_11 = arith.constant 0 : index
    %21 = vector.load %arg1[%20, %c0_10, %c0_11] : memref<8x8x32xf32, #tpu.memory_space<vmem>>, vector<1x8x32xf32>
    %22 = vector.shape_cast %21 : vector<1x8x32xf32> to vector<8x32xf32>
    %cst_12 = arith.constant dense<0.000000e+00> : vector<8x32xf32>
    %23 = tpu.matmul %19, %0, %cst_12 {dimension_numbers = #tpu.dot_dimension_numbers<[1], [0], [0], [1], [0, 0, 1, 1], [], []>} : vector<8x32xf32>, vector<32x32xf32>, vector<8x32xf32> -> vector<8x32xf32>
    %24 = arith.addf %22, %23 : vector<8x32xf32>
    %25 = math.tanh %24 : vector<8x32xf32>
    %c4_i32 = arith.constant 4 : i32
    %26 = arith.index_cast %c4_i32 : i32 to index
    %c0_13 = arith.constant 0 : index
    %c0_14 = arith.constant 0 : index
    %27 = vector.load %arg1[%26, %c0_13, %c0_14] : memref<8x8x32xf32, #tpu.memory_space<vmem>>, vector<1x8x32xf32>
    %28 = vector.shape_cast %27 : vector<1x8x32xf32> to vector<8x32xf32>
    %cst_15 = arith.constant dense<0.000000e+00> : vector<8x32xf32>
    %29 = tpu.matmul %25, %0, %cst_15 {dimension_numbers = #tpu.dot_dimension_numbers<[1], [0], [0], [1], [0, 0, 1, 1], [], []>} : vector<8x32xf32>, vector<32x32xf32>, vector<8x32xf32> -> vector<8x32xf32>
    %30 = arith.addf %28, %29 : vector<8x32xf32>
    %31 = math.tanh %30 : vector<8x32xf32>
    %c5_i32 = arith.constant 5 : i32
    %32 = arith.index_cast %c5_i32 : i32 to index
    %c0_16 = arith.constant 0 : index
    %c0_17 = arith.constant 0 : index
    %33 = vector.load %arg1[%32, %c0_16, %c0_17] : memref<8x8x32xf32, #tpu.memory_space<vmem>>, vector<1x8x32xf32>
    %34 = vector.shape_cast %33 : vector<1x8x32xf32> to vector<8x32xf32>
    %cst_18 = arith.constant dense<0.000000e+00> : vector<8x32xf32>
    %35 = tpu.matmul %31, %0, %cst_18 {dimension_numbers = #tpu.dot_dimension_numbers<[1], [0], [0], [1], [0, 0, 1, 1], [], []>} : vector<8x32xf32>, vector<32x32xf32>, vector<8x32xf32> -> vector<8x32xf32>
    %36 = arith.addf %34, %35 : vector<8x32xf32>
    %37 = math.tanh %36 : vector<8x32xf32>
    %c6_i32 = arith.constant 6 : i32
    %38 = arith.index_cast %c6_i32 : i32 to index
    %c0_19 = arith.constant 0 : index
    %c0_20 = arith.constant 0 : index
    %39 = vector.load %arg1[%38, %c0_19, %c0_20] : memref<8x8x32xf32, #tpu.memory_space<vmem>>, vector<1x8x32xf32>
    %40 = vector.shape_cast %39 : vector<1x8x32xf32> to vector<8x32xf32>
    %cst_21 = arith.constant dense<0.000000e+00> : vector<8x32xf32>
    %41 = tpu.matmul %37, %0, %cst_21 {dimension_numbers = #tpu.dot_dimension_numbers<[1], [0], [0], [1], [0, 0, 1, 1], [], []>} : vector<8x32xf32>, vector<32x32xf32>, vector<8x32xf32> -> vector<8x32xf32>
    %42 = arith.addf %40, %41 : vector<8x32xf32>
    %43 = math.tanh %42 : vector<8x32xf32>
    %c7_i32 = arith.constant 7 : i32
    %44 = arith.index_cast %c7_i32 : i32 to index
    %c0_22 = arith.constant 0 : index
    %c0_23 = arith.constant 0 : index
    %45 = vector.load %arg1[%44, %c0_22, %c0_23] : memref<8x8x32xf32, #tpu.memory_space<vmem>>, vector<1x8x32xf32>
    %46 = vector.shape_cast %45 : vector<1x8x32xf32> to vector<8x32xf32>
    %cst_24 = arith.constant dense<0.000000e+00> : vector<8x32xf32>
    %47 = tpu.matmul %43, %0, %cst_24 {dimension_numbers = #tpu.dot_dimension_numbers<[1], [0], [0], [1], [0, 0, 1, 1], [], []>} : vector<8x32xf32>, vector<32x32xf32>, vector<8x32xf32> -> vector<8x32xf32>
    %48 = arith.addf %46, %47 : vector<8x32xf32>
    %49 = math.tanh %48 : vector<8x32xf32>
    %c8_i32 = arith.constant 8 : i32
    %c0_25 = arith.constant 0 : index
    %c0_26 = arith.constant 0 : index
    %50 = vector.load %arg3[%c0_25, %c0_26] : memref<32x128xf32, #tpu.memory_space<vmem>>, vector<32x128xf32>
    %cst_27 = arith.constant dense<0.000000e+00> : vector<8x128xf32>
    %51 = tpu.matmul %49, %50, %cst_27 {dimension_numbers = #tpu.dot_dimension_numbers<[1], [0], [0], [1], [0, 0, 1, 1], [], []>} : vector<8x32xf32>, vector<32x128xf32>, vector<8x128xf32> -> vector<8x128xf32>
    %c0_28 = arith.constant 0 : index
    %c0_29 = arith.constant 0 : index
    %52 = vector.load %arg4[%c0_28, %c0_29] : memref<1x128xf32, #tpu.memory_space<vmem>>, vector<1x128xf32>
    %53 = vector.broadcast %52 : vector<1x128xf32> to vector<8x128xf32>
    %54 = arith.addf %51, %53 : vector<8x128xf32>
    %cst_30 = arith.constant dense<0xFF800000> : vector<8xf32>
    %55 = vector.multi_reduction <maximumf>, %54, %cst_30 [1] : vector<8x128xf32> to vector<8xf32>
    %56 = vector.shape_cast %55 : vector<8xf32> to vector<8x1xf32>
    %57 = vector.broadcast %56 : vector<8x1xf32> to vector<8x128xf32>
    %58 = arith.subf %54, %57 : vector<8x128xf32>
    %59 = math.exp %58 : vector<8x128xf32>
    %cst_31 = arith.constant dense<0.000000e+00> : vector<8xf32>
    %60 = vector.multi_reduction <add>, %59, %cst_31 [1] : vector<8x128xf32> to vector<8xf32>
    %61 = vector.shape_cast %60 : vector<8xf32> to vector<8x1xf32>
    %62 = tpu.reciprocal %61 {approx = true} : vector<8x1xf32> -> vector<8x1xf32>
    %63 = vector.broadcast %62 : vector<8x1xf32> to vector<8x128xf32>
    %64 = arith.mulf %59, %63 : vector<8x128xf32>
    %c0_32 = arith.constant 0 : index
    %c0_33 = arith.constant 0 : index
    %65 = vector.load %arg5[%c0_32, %c0_33] : memref<8x128xf32, #tpu.memory_space<vmem>>, vector<8x128xf32>
    tpu.vector_store %arg5[%c0_32, %c0_33], %64 {strides = array<i32>} : memref<8x128xf32, #tpu.memory_space<vmem>>, vector<8x128xf32>,
    return
  }
  func.func @transform_0(%arg0: i32) -> (i32, i32, i32) {
    %c0_i32 = arith.constant 0 : i32
    %c0_i32_0 = arith.constant 0 : i32
    %c0_i32_1 = arith.constant 0 : i32
    return %c0_i32, %arg0, %c0_i32_0 : i32, i32, i32
  }
  func.func @transform_1(%arg0: i32) -> (i32, i32) {
    %c0_i32 = arith.constant 0 : i32
    %c0_i32_0 = arith.constant 0 : i32
    %c0_i32_1 = arith.constant 0 : i32
    return %c0_i32, %c0_i32_0 : i32, i32
  }
  func.func @transform_2(%arg0: i32) -> (i32, i32) {
    %c0_i32 = arith.constant 0 : i32
    %c0_i32_0 = arith.constant 0 : i32
    %c0_i32_1 = arith.constant 0 : i32
    return %c0_i32, %c0_i32_0 : i32, i32
  }
  func.func @transform_3(%arg0: i32) -> (i32, i32) {
    %c0_i32 = arith.constant 0 : i32
    %c0_i32_0 = arith.constant 0 : i32
    %c0_i32_1 = arith.constant 0 : i32
    return %c0_i32, %c0_i32_0 : i32, i32
  }
  func.func @transform_4(%arg0: i32) -> (i32, i32) {
    %c0_i32 = arith.constant 0 : i32
    %c0_i32_0 = arith.constant 0 : i32
    return %arg0, %c0_i32 : i32, i32
  }
}

</mosaic_0001>

<bundles_post_ra>
// kernel: tpu_custom_call.1
= control target key start
LH: loop header
LB: loop body
LE: loop exit
PB: predicated region body
PF: predicated region fallthrough
CT: control target
= control target key end

     0   :  { %9 = vsyncpa [#allocation3], 0  ;;  %s537_s0 = inlined_call_operand.hbm [shape: f32[8,8,32], index: 0, kind: input, shape index: {}]   ;;  %s538_s1 = inlined_call_operand.hbm [shape: f32[32,32], index: 1, kind: input, shape index: {}]   ;;  %s539_s2 = inlined_call_operand.hbm [shape: f32[32,128], index: 2, kind: input, shape index: {}]   ;;  %s540_s3 = inlined_call_operand.vmem [shape: f32[1,128], index: 3, kind: input, shape index: {}]   ;;  %s541_s4 = inlined_call_operand.hbm [shape: f32[8,128], index: 4, kind: output, shape index: {}]  }
   0x1   :  { %10 = vsyncpa [#allocation6], 0 }
   0x2   :  { %11 = vsyncpa [#allocation4], 0  ;;  %s29_s17 = sshll.u32 %s538_s1, 4  ;;  %s482_s18 = smov [#allocation5]   ;;  %s30_s17 = int_to_ptr.hbm [resolvable:$true] %s29_s17 }
   0x3   :  { %s31_s19 = sshll.u32 %s482_s18, 4  ;;  %s16_s22 = sshll.u32 %s537_s0, 4  ;;  %s32_s19 = int_to_ptr.vmem [resolvable:$true] %s31_s19  ;;  %s17_s22 = int_to_ptr.hbm [resolvable:$true] %s16_s22 }
   0x4   :  { %s483_s23 = smov 128   ;;  %s484_s24 = smov 8  }
   0x5   :  { %37 = dma.hbm_to_vmem [thread:$0]  %s30_s17, 512, %s32_s19, [#allocation6], %s483_s23, %s483_s23, %s484_s24  }
   0x6   :  { %s485_s25 = smov [#allocation2]   ;;  %s42_s29 = sshll.u32 %s539_s2, 4  ;;  %s43_s29 = int_to_ptr.hbm [resolvable:$true] %s42_s29 }
   0x7   :  { %s18_s26 = sshll.u32 %s485_s25, 4  ;;  %s486_s1 = smov [#allocation7]   ;;  %s19_s26 = int_to_ptr.vmem [resolvable:$true] %s18_s26 }
   0x8   :  { %24 = dma.hbm_to_vmem [thread:$0]  %s17_s22, 1024, %s19_s26, [#allocation3], %s483_s23, %s483_s23, %s484_s24  }
   0x9   :  { %s44_s30 = sshll.u32 %s486_s1, 4  ;;  %s45_s30 = int_to_ptr.vmem [resolvable:$true] %s44_s30 }
   0xa   :  { %50 = dma.hbm_to_vmem [thread:$0]  %s43_s29, 512, %s45_s30, [#allocation6], %s483_s23, %s483_s23, %s484_s24  }
   0xb   :  { %476 = dma.done.wait [#allocation3], 1024  }
   0xc   :  { %477 = vsyncadd [#allocation3], 4294966272 }
   0xd   :  { %478 = dma.done.wait [#allocation6], 1024  }
   0xe   :  { %479 = vsyncadd [#allocation6], 4294966272  ;;  %v68_v0 = vld [vmem:[#allocation5 + $0x18] sm:$0xff]  ;;  %v67_v1 = vld [vmem:[#allocation5 + $0x10] sm:$0xff]  ;;  %v487_v4 = vmov 0.0   ;;  %vm70_vm0 = vcmask 261120  }
   0xf   :  { %86 = vmatpush.msra.mxu0 %v68_v0  ;;  %113 = vmatpush.msra.mxu1 %v68_v0  ;;  %v66_v2 = vld [vmem:[#allocation5 + $0x8] sm:$0xff]  ;;  %v65_v3 = vld [vmem:[#allocation5] sm:$0xff]  ;;  %v124_v13 = vld [vmem:[#allocation2 + $0x10] sm:$0xff]  ;;  %s488_s5 = smov [#allocation8]   ;;  %s333_s9 = sshll.u32 %s541_s4, 4  ;;  %s334_s9 = int_to_ptr.hbm [resolvable:$true] %s333_s9 }
  0x10   :  { %140 = vmatpush.msra.mxu2 %v68_v0  ;;  %167 = vmatpush.msra.mxu3 %v68_v0  ;;  %v69_v5 = vld [vmem:[#allocation2] sm:$0xff]  ;;  %v97_v9 = vld [vmem:[#allocation2 + $0x8] sm:$0xff]  ;;  %v151_v17 = vld [vmem:[#allocation2 + $0x18] sm:$0xff]  ;;  %s331_s6 = sshll.u32 %s488_s5, 4  ;;  %s332_s6 = int_to_ptr.vmem [resolvable:$true] %s331_s6 }
  0x11   :  { %87 = vmatpush.msra.mxu0 %v67_v1  ;;  %114 = vmatpush.msra.mxu1 %v67_v1  ;;  %v178_v21 = vld [vmem:[#allocation2 + $0x20] sm:$0xff]  ;;  %v205_v25 = vld [vmem:[#allocation2 + $0x28] sm:$0xff]  ;;  %v232_v29 = vld [vmem:[#allocation2 + $0x30] sm:$0xff] }
  0x12   :  { %141 = vmatpush.msra.mxu2 %v67_v1  ;;  %168 = vmatpush.msra.mxu3 %v67_v1  ;;  %v288_v33 = vld [vmem:[#allocation7 + $0x18] sm:$0xff]  ;;  %v287_v34 = vld [vmem:[#allocation7 + $0x10] sm:$0xff]  ;;  %v286_v35 = vld [vmem:[#allocation7 + $0x8] sm:$0xff] }
  0x13   :  { %88 = vmatpush.msra.mxu0 %v66_v2  ;;  %115 = vmatpush.msra.mxu1 %v66_v2  ;;  %v285_v36 = vld [vmem:[#allocation7] sm:$0xff]  ;;  %v259_v37 = vld [vmem:[#allocation2 + $0x38] sm:$0xff] }
  0x14   :  { %142 = vmatpush.msra.mxu2 %v66_v2  ;;  %169 = vmatpush.msra.mxu3 %v66_v2  ;;  %v359_v41 = vld [vmem:[%s540_s3] ss:$0 sm:$0xff] }
  0x15   :  { %89 = vmatpush.msra.mxu0 %v65_v3  ;;  %116 = vmatpush.msra.mxu1 %v65_v3 }
  0x16   :  { %90 = vmatmul.f32.vlgmr.msra.gmra.mxu0 %v487_v4  ;;  %143 = vmatpush.msra.mxu2 %v65_v3 }
  0x17   :  { %170 = vmatpush.msra.mxu3 %v65_v3  ;;  %194 = vmatpush.msrb.mxu0 %v68_v0 }
  0x18   :  { %221 = vmatpush.msrb.mxu1 %v68_v0  ;;  %248 = vmatpush.msrb.mxu2 %v68_v0 }
  0x19   :  { %195 = vmatpush.msrb.mxu0 %v67_v1  ;;  %275 = vmatpush.msrb.mxu3 %v68_v0 }
  0x1a   :  { %222 = vmatpush.msrb.mxu1 %v67_v1  ;;  %249 = vmatpush.msrb.mxu2 %v67_v1 }
  0x1b   :  { %196 = vmatpush.msrb.mxu0 %v66_v2  ;;  %276 = vmatpush.msrb.mxu3 %v67_v1 }
  0x1c   :  { %223 = vmatpush.msrb.mxu1 %v66_v2  ;;  %250 = vmatpush.msrb.mxu2 %v66_v2 }
  0x1d   :  { %197 = vmatpush.msrb.mxu0 %v65_v3  ;;  %277 = vmatpush.msrb.mxu3 %v66_v2 }
  0x1e   :  { %224 = vmatpush.msrb.mxu1 %v65_v3  ;;  %251 = vmatpush.msrb.mxu2 %v65_v3 }
  0x1f   :  { %278 = vmatpush.msrb.mxu3 %v65_v3  ;;  %308 = vmatpush.msra.mxu0 %v288_v33 }
  0x21   :  { %309 = vmatpush.msra.mxu0 %v287_v34 }
  0x23   :  { %310 = vmatpush.msra.mxu0 %v286_v35 }
  0x25   :  { %311 = vmatpush.msra.mxu0 %v285_v36 }
  0x93   :  { %v91_v6 = vpop.f32.mrf.mxu0 }
  0x94   :  { %v94_v7 = vadd.f32 %v91_v6, %v69_v5 }
  0x96   :  { %360 = vtanh.f32 %v94_v7 }
  0x9c   :  { %v361_v8 = vpop.eup %360 }
  0x9d   :  { %344 = vmatmul.msk.f32.vlgmr.msra.gmra.mxu1 %vm70_vm0, %v361_v8 }
 0x11a   :  { %v118_v10 = vpop.f32.mrf.mxu1 }
 0x11b   :  { %v121_v11 = vadd.f32 %v118_v10, %v97_v9 }
 0x11d   :  { %362 = vtanh.f32 %v121_v11 }
 0x123   :  { %v363_v12 = vpop.eup %362 }
 0x124   :  { %345 = vmatmul.msk.f32.vlgmr.msra.gmra.mxu2 %vm70_vm0, %v363_v12 }
 0x1a7   :  { %v145_v14 = vpop.f32.mrf.mxu2 }
 0x1a8   :  { %v148_v15 = vadd.f32 %v145_v14, %v124_v13 }
 0x1aa   :  { %364 = vtanh.f32 %v148_v15 }
 0x1b0   :  { %v365_v16 = vpop.eup %364 }
 0x1b1   :  { %346 = vmatmul.msk.f32.vlgmr.msra.gmra.mxu3 %vm70_vm0, %v365_v16 }
 0x234   :  { %v172_v18 = vpop.f32.mrf.mxu3 }
 0x235   :  { %v175_v19 = vadd.f32 %v172_v18, %v151_v17 }
 0x237   :  { %366 = vtanh.f32 %v175_v19 }
 0x23d   :  { %v367_v20 = vpop.eup %366 }
 0x23e   :  { %347 = vmatmul.msk.f32.vlgmr.msrb.gmra.mxu0 %vm70_vm0, %v367_v20 }
 0x2bb   :  { %v199_v22 = vpop.f32.mrf.mxu0 }
 0x2bc   :  { %v202_v23 = vadd.f32 %v199_v22, %v178_v21 }
 0x2be   :  { %368 = vtanh.f32 %v202_v23 }
 0x2c4   :  { %v369_v24 = vpop.eup %368 }
 0x2c5   :  { %348 = vmatmul.msk.f32.vlgmr.msrb.gmra.mxu1 %vm70_vm0, %v369_v24 }
 0x342   :  { %v226_v26 = vpop.f32.mrf.mxu1 }
 0x343   :  { %v229_v27 = vadd.f32 %v226_v26, %v205_v25 }
 0x345   :  { %370 = vtanh.f32 %v229_v27 }
 0x34b   :  { %v371_v28 = vpop.eup %370 }
 0x34c   :  { %349 = vmatmul.msk.f32.vlgmr.msrb.gmra.mxu2 %vm70_vm0, %v371_v28 }
 0x3cf   :  { %v253_v30 = vpop.f32.mrf.mxu2 }
 0x3d0   :  { %v256_v31 = vadd.f32 %v253_v30, %v232_v29 }
 0x3d2   :  { %372 = vtanh.f32 %v256_v31 }
 0x3d8   :  { %v373_v32 = vpop.eup %372 }
 0x3d9   :  { %350 = vmatmul.msk.f32.vlgmr.msrb.gmra.mxu3 %vm70_vm0, %v373_v32 }
 0x45c   :  { %v280_v38 = vpop.f32.mrf.mxu3 }
 0x45d   :  { %v283_v39 = vadd.f32 %v280_v38, %v259_v37 }
 0x45f   :  { %374 = vtanh.f32 %v283_v39 }
 0x465   :  { %v375_v40 = vpop.eup %374 }
 0x466   :  { %351 = vmatmul.msk.f32.vlgmr.msra.gmra.mxu0 %vm70_vm0, %v375_v40 }
 0x4e3   :  { %v313_v42 = vpop.f32.mrf.mxu0 }
 0x4e4   :  { %v314_v43 = vadd.f32 %v359_v41, %v313_v42 }
 0x4e6   :  { %316 = vmax.xlane.f32.xlu0 %v314_v43 }
 0x559   :  { %v317_v44 = vpop.xlane.xlu0 %316 }
 0x55a   :  { %v318_v45 = vsub.f32 %v314_v43, %v317_v44 }
 0x55c   :  { %v319_v46 = vmul.f32 1.442695, %v318_v45 }
 0x55e   :  { %376 = vpow2.f32 %v319_v46 }
 0x564   :  { %v377_v47 = vpop.eup %376 }
 0x565   :  { %321 = vadd.xlane.f32.xlu0 %v377_v47 }
 0x5d8   :  { %v322_v48 = vpop.xlane.xlu0 %321 }
 0x5d9   :  { %378 = vrcp.f32 %v322_v48 }
 0x5df   :  { %v379_v49 = vpop.eup %378 }
 0x5e0   :  { %v324_v50 = vmul.f32 %v379_v49, %v377_v47 }
 0x5e2   :  { %325 = vst [vmem:[#allocation8] sm:$0xff] %v324_v50 }
 0x5e3   :  { %336 = dma.vmem_to_hbm [thread:$0]  %s332_s6, 128, %s334_s9, [#allocation4]  }
 0x5e4   :  { %480 = dma.done.wait [#allocation4], 128  }
 0x5e5   :  { %481 = vsyncadd [#allocation4], 4294967168 }
 0x5e6   :  { %341 = vsyncpa [#allocation3], 1 }
 0x5e7   :  { %342 = vsyncpa [#allocation6], 1 }
 0x5e8   :  { %343 = vsyncpa [#allocation4], 1 }

</bundles_post_ra>
